<compile_context>
chip_gen: v7x
topology: tpu7x:2x2x1
jax: 0.10.0
libtpu: 0.0.40
codegen_flags: <defaults>
</compile_context>

<pallas_src>
import math

import jax
import jax.numpy as jnp
from jax.experimental import pallas as pl
from jax.experimental.pallas import tpu as pltpu

BN_EPS = 1e-5


def make_lossnet_kernel(num_layer):
    def kernel(*refs):
        feat_refs = refs[:num_layer]                 # each (1, C_i, L)  bf16  VMEM
        w_refs = refs[num_layer:2 * num_layer]       # each (C_i, 1)     f32   VMEM (BN-folded)
        linw_ref = refs[2 * num_layer]               # (NL, L)           f32   VMEM
        bnb_ref = refs[2 * num_layer + 1]            # (NL,)             f32   SMEM (folded BN bias)
        linb_ref = refs[2 * num_layer + 2]           # (1,)              f32   SMEM (linear bias)
        out_ref = refs[2 * num_layer + 3]            # (1, 1, 1)         f32   VMEM

        linw = linw_ref[...]                                             # (NL, L), one small tile
        acc = jnp.full((1, 1), linb_ref[0], dtype=jnp.float32)
        for i in range(num_layer):                   # NUM_LAYER is tiny -> static unroll
            f = feat_refs[i][0].astype(jnp.float32)                      # (C_i, L) upcast on VPU
            w = w_refs[i][...]                                           # (C_i, 1), BN scale folded
            # Conv1d(k=1, bias=False) + folded BN scale: channel contraction on VPU/XLU.
            conv = jnp.sum(f * w, axis=0, keepdims=True)                 # (1, L) sublane reduce
            y = jnp.maximum(conv + bnb_ref[i], 0.0)                      # (1, L) bias + ReLU
            # Per-layer slice of the final Linear: acc += <lin_w[i, :], y>.
            acc = acc + jnp.sum(linw[i:i + 1, :] * y, axis=1, keepdims=True)  # (1, 1)
        out_ref[...] = acc.reshape(1, 1, 1)

    return kernel


def lossnet_forward(features_list, conv_weights, bn_params, lin_w, lin_b):
    """features_list: list of (B, C_i, L); conv_weights: list of (1, C_i, 1);
    bn_params: (4, NL) rows = gamma, beta, running_mean, running_var;
    lin_w: (1, NL*L); lin_b: (1,).  Returns (B, 1)."""
    nl = len(features_list)
    B, _, L = features_list[0].shape

    gamma, beta, mean, var = bn_params[0], bn_params[1], bn_params[2], bn_params[3]
    scale = gamma * jax.lax.rsqrt(var.astype(jnp.float32) + BN_EPS)      # (NL,)
    bn_bias = (beta - mean * scale).astype(jnp.float32)                  # (NL,)

    # Features: native layout, bf16 (kernel is HBM-bound -> halves the big transfer).
    feats = [f.astype(jnp.bfloat16) for f in features_list]              # (B, C_i, L)
    # BN scale folded into the (tiny) conv weights; keep them f32 for accuracy.
    folded_w = [
        (conv_weights[i].reshape(-1, 1).astype(jnp.float32) * scale[i])  # (C_i, 1)
        for i in range(nl)
    ]
    # Linear weight as (NL, L): row i multiplies layer i's chunk -> no concat needed.
    linw = lin_w.reshape(nl, L).astype(jnp.float32)                      # (NL, L)
    linb = lin_b.reshape(1).astype(jnp.float32)                          # (1,)

    feat_specs = [
        pl.BlockSpec((1, f.shape[1], L), lambda b: (b, 0, 0)) for f in feats
    ]
    w_specs = [pl.BlockSpec(w.shape, lambda b: (0, 0)) for w in folded_w]
    linw_spec = pl.BlockSpec((nl, L), lambda b: (0, 0))
    smem = pl.BlockSpec(memory_space=pltpu.MemorySpace.SMEM)

    out = pl.pallas_call(
        make_lossnet_kernel(nl),
        out_shape=jax.ShapeDtypeStruct((B, 1, 1), jnp.float32),
        grid=(B,),
        in_specs=feat_specs + w_specs + [linw_spec, smem, smem],
        out_specs=pl.BlockSpec((1, 1, 1), lambda b: (b, 0, 0)),
        compiler_params=pltpu.CompilerParams(
            dimension_semantics=("parallel",),       # megacore split over B on v7x
            vmem_limit_bytes=32 * 1024 * 1024,       # explicit: safe on v5e/v6e/v7x
        ),
    )(*feats, *folded_w, linw, bn_bias, linb)
    return out.reshape(B, 1)


if __name__ == "__main__":
    # Small synthetic config:
    #   model_cfg.LOSS_NET.SHARED_FC = [32, 32]   (-> num_layer = 2)
    #   model_cfg.TARGET_CONFIG.ROI_PER_IMAGE = 16
    # (Production-size benchmarking should use ROI_PER_IMAGE=128-class sizes and xprof;
    #  this harness only checks correctness.)
    SHARED_FC = [32, 32]
    ROI_PER_IMAGE = 16
    B = 2
    num_layer = len(SHARED_FC)

    key = jax.random.PRNGKey(0)
    keys = jax.random.split(key, 2 * num_layer + 6)

    features = []
    conv_weights = []
    for i, c in enumerate(SHARED_FC):
        features.append(
            jax.random.normal(keys[2 * i], (B, c, ROI_PER_IMAGE), dtype=jnp.float32))
        # xavier_normal_ for Conv1d(c, 1, kernel_size=1): std = sqrt(2 / (fan_in + fan_out))
        std = math.sqrt(2.0 / (c + 1))
        conv_weights.append(
            std * jax.random.normal(keys[2 * i + 1], (1, c, 1), dtype=jnp.float32))

    # Non-trivial BatchNorm1d(1) inference-mode parameters (exercises the BN fold).
    gamma = 0.5 + jax.random.uniform(keys[-6], (num_layer,), jnp.float32)
    beta = 0.1 * jax.random.normal(keys[-5], (num_layer,), jnp.float32)
    r_mean = 0.1 * jax.random.normal(keys[-4], (num_layer,), jnp.float32)
    r_var = 0.5 + jax.random.uniform(keys[-3], (num_layer,), jnp.float32)
    bn_params = jnp.stack([gamma, beta, r_mean, r_var])    # (4, NL)

    total_dim = ROI_PER_IMAGE * num_layer
    bound = 1.0 / math.sqrt(total_dim)          # PyTorch default nn.Linear init range
    lin_w = jax.random.uniform(keys[-2], (1, total_dim), jnp.float32, -bound, bound)
    lin_b = jax.random.uniform(keys[-1], (1,), jnp.float32, -bound, bound)

    out = lossnet_forward(features, conv_weights, bn_params, lin_w, lin_b)
    out = jax.block_until_ready(out)
    assert out.shape == (B, 1)

    # Plain-JAX reference (inference-mode BN), using the same bf16-rounded features
    # the kernel consumes so the comparison is apples-to-apples.
    ref_chunks = []
    for i in range(num_layer):
        f_q = features[i].astype(jnp.bfloat16).astype(jnp.float32)
        conv = jnp.einsum('bcl,c->bl', f_q, conv_weights[i].reshape(-1))
        y = (conv - r_mean[i]) * jax.lax.rsqrt(r_var[i] + BN_EPS) * gamma[i] + beta[i]
        y = jnp.maximum(y, 0.0)
        ref_chunks.append(y.reshape(B, -1))
    ref = jnp.concatenate(ref_chunks, axis=1) @ lin_w.T + lin_b

    assert jnp.allclose(out, ref, atol=1e-2, rtol=1e-2), (out, ref)
    print("KERNEL_OK")
</pallas_src>

<mosaic_0001>
module attributes {stable_mosaic.version = 11 : i64} {
  func.func @kernel(%arg0: i32, %arg1: memref<1x32x16xbf16, #tpu.memory_space<vmem>>, %arg2: memref<1x32x16xbf16, #tpu.memory_space<vmem>>, %arg3: memref<32x1xf32, #tpu.memory_space<vmem>>, %arg4: memref<32x1xf32, #tpu.memory_space<vmem>>, %arg5: memref<2x16xf32, #tpu.memory_space<vmem>>, %arg6: memref<2xf32, #tpu.memory_space<smem>>, %arg7: memref<1xf32, #tpu.memory_space<smem>>, %arg8: memref<1x1x1xf32, #tpu.memory_space<vmem>>) attributes {dimension_semantics = [#tpu.dimension_semantics<parallel>], iteration_bounds = array<i64: 2>, scalar_prefetch = 0 : i64, scratch_operands = 0 : i64, tpu.core_type = #tpu.core_type<tc>, window_params = [{transform_indices = @transform_0, window_bounds = array<i64: 1, 32, 16>}, {transform_indices = @transform_1, window_bounds = array<i64: 1, 32, 16>}, {pipeline_mode = #tpu.pipeline_mode<synchronous>, transform_indices = @transform_2, window_bounds = array<i64: 32, 1>}, {pipeline_mode = #tpu.pipeline_mode<synchronous>, transform_indices = @transform_3, window_bounds = array<i64: 32, 1>}, {pipeline_mode = #tpu.pipeline_mode<synchronous>, transform_indices = @transform_4, window_bounds = array<i64: 2, 16>}, {transform_indices = @transform_5, window_bounds = array<i64: 2>}, {transform_indices = @transform_6, window_bounds = array<i64: 1>}, {transform_indices = @transform_7, window_bounds = array<i64: 1, 1, 1>}]} {
    %c0 = arith.constant 0 : index
    %c0_0 = arith.constant 0 : index
    %0 = vector.load %arg5[%c0, %c0_0] : memref<2x16xf32, #tpu.memory_space<vmem>>, vector<2x16xf32>
    %c0_1 = arith.constant 0 : index
    %1 = memref.load %arg7[%c0_1] : memref<1xf32, #tpu.memory_space<smem>>
    %2 = vector.broadcast %1 : f32 to vector<1x1xf32>
    %c0_2 = arith.constant 0 : index
    %c0_3 = arith.constant 0 : index
    %c0_4 = arith.constant 0 : index
    %3 = vector.load %arg1[%c0_2, %c0_3, %c0_4] : memref<1x32x16xbf16, #tpu.memory_space<vmem>>, vector<1x32x16xbf16>
    %4 = vector.shape_cast %3 : vector<1x32x16xbf16> to vector<32x16xbf16>
    %5 = arith.extf %4 : vector<32x16xbf16> to vector<32x16xf32>
    %c0_5 = arith.constant 0 : index
    %c0_6 = arith.constant 0 : index
    %6 = vector.load %arg3[%c0_5, %c0_6] : memref<32x1xf32, #tpu.memory_space<vmem>>, vector<32x1xf32>
    %7 = vector.broadcast %6 : vector<32x1xf32> to vector<32x16xf32>
    %8 = arith.mulf %5, %7 : vector<32x16xf32>
    %cst = arith.constant dense<0.000000e+00> : vector<16xf32>
    %9 = vector.multi_reduction <add>, %8, %cst [0] : vector<32x16xf32> to vector<16xf32>
    %10 = vector.shape_cast %9 : vector<16xf32> to vector<1x16xf32>
    %c0_7 = arith.constant 0 : index
    %11 = memref.load %arg6[%c0_7] : memref<2xf32, #tpu.memory_space<smem>>
    %12 = vector.broadcast %11 : f32 to vector<1x16xf32>
    %13 = arith.addf %10, %12 : vector<1x16xf32>
    %cst_8 = arith.constant 0.000000e+00 : f32
    %14 = vector.broadcast %cst_8 : f32 to vector<1x16xf32>
    %15 = arith.maximumf %13, %14 : vector<1x16xf32>
    %16 = vector.extract_strided_slice %0 {offsets = [0, 0], sizes = [1, 16], strides = [1, 1]} : vector<2x16xf32> to vector<1x16xf32>
    %17 = arith.mulf %16, %15 : vector<1x16xf32>
    %cst_9 = arith.constant dense<0.000000e+00> : vector<1xf32>
    %18 = vector.multi_reduction <add>, %17, %cst_9 [1] : vector<1x16xf32> to vector<1xf32>
    %19 = vector.shape_cast %18 : vector<1xf32> to vector<1x1xf32>
    %20 = arith.addf %2, %19 : vector<1x1xf32>
    %c0_10 = arith.constant 0 : index
    %c0_11 = arith.constant 0 : index
    %c0_12 = arith.constant 0 : index
    %21 = vector.load %arg2[%c0_10, %c0_11, %c0_12] : memref<1x32x16xbf16, #tpu.memory_space<vmem>>, vector<1x32x16xbf16>
    %22 = vector.shape_cast %21 : vector<1x32x16xbf16> to vector<32x16xbf16>
    %23 = arith.extf %22 : vector<32x16xbf16> to vector<32x16xf32>
    %c0_13 = arith.constant 0 : index
    %c0_14 = arith.constant 0 : index
    %24 = vector.load %arg4[%c0_13, %c0_14] : memref<32x1xf32, #tpu.memory_space<vmem>>, vector<32x1xf32>
    %25 = vector.broadcast %24 : vector<32x1xf32> to vector<32x16xf32>
    %26 = arith.mulf %23, %25 : vector<32x16xf32>
    %cst_15 = arith.constant dense<0.000000e+00> : vector<16xf32>
    %27 = vector.multi_reduction <add>, %26, %cst_15 [0] : vector<32x16xf32> to vector<16xf32>
    %28 = vector.shape_cast %27 : vector<16xf32> to vector<1x16xf32>
    %c1 = arith.constant 1 : index
    %29 = memref.load %arg6[%c1] : memref<2xf32, #tpu.memory_space<smem>>
    %30 = vector.broadcast %29 : f32 to vector<1x16xf32>
    %31 = arith.addf %28, %30 : vector<1x16xf32>
    %cst_16 = arith.constant 0.000000e+00 : f32
    %32 = vector.broadcast %cst_16 : f32 to vector<1x16xf32>
    %33 = arith.maximumf %31, %32 : vector<1x16xf32>
    %34 = vector.extract_strided_slice %0 {offsets = [1, 0], sizes = [1, 16], strides = [1, 1]} : vector<2x16xf32> to vector<1x16xf32>
    %35 = arith.mulf %34, %33 : vector<1x16xf32>
    %cst_17 = arith.constant dense<0.000000e+00> : vector<1xf32>
    %36 = vector.multi_reduction <add>, %35, %cst_17 [1] : vector<1x16xf32> to vector<1xf32>
    %37 = vector.shape_cast %36 : vector<1xf32> to vector<1x1xf32>
    %38 = arith.addf %20, %37 : vector<1x1xf32>
    %39 = vector.shape_cast %38 : vector<1x1xf32> to vector<1x1x1xf32>
    %c0_18 = arith.constant 0 : index
    %c0_19 = arith.constant 0 : index
    %c0_20 = arith.constant 0 : index
    %40 = vector.load %arg8[%c0_18, %c0_19, %c0_20] : memref<1x1x1xf32, #tpu.memory_space<vmem>>, vector<1x1x1xf32>
    tpu.vector_store %arg8[%c0_18, %c0_19, %c0_20], %39 {strides = array<i32>} : memref<1x1x1xf32, #tpu.memory_space<vmem>>, vector<1x1x1xf32>,
    return
  }
  func.func @transform_0(%arg0: i32) -> (i32, i32, i32) {
    %c0_i32 = arith.constant 0 : i32
    %c0_i32_0 = arith.constant 0 : i32
    %c0_i32_1 = arith.constant 0 : i32
    return %arg0, %c0_i32, %c0_i32_0 : i32, i32, i32
  }
  func.func @transform_1(%arg0: i32) -> (i32, i32, i32) {
    %c0_i32 = arith.constant 0 : i32
    %c0_i32_0 = arith.constant 0 : i32
    %c0_i32_1 = arith.constant 0 : i32
    return %arg0, %c0_i32, %c0_i32_0 : i32, i32, i32
  }
  func.func @transform_2(%arg0: i32) -> (i32, i32) {
    %c0_i32 = arith.constant 0 : i32
    %c0_i32_0 = arith.constant 0 : i32
    %c0_i32_1 = arith.constant 0 : i32
    return %c0_i32, %c0_i32_0 : i32, i32
  }
  func.func @transform_3(%arg0: i32) -> (i32, i32) {
    %c0_i32 = arith.constant 0 : i32
    %c0_i32_0 = arith.constant 0 : i32
    %c0_i32_1 = arith.constant 0 : i32
    return %c0_i32, %c0_i32_0 : i32, i32
  }
  func.func @transform_4(%arg0: i32) -> (i32, i32) {
    %c0_i32 = arith.constant 0 : i32
    %c0_i32_0 = arith.constant 0 : i32
    %c0_i32_1 = arith.constant 0 : i32
    return %c0_i32, %c0_i32_0 : i32, i32
  }
  func.func @transform_5(%arg0: i32) -> i32 {
    %c0_i32 = arith.constant 0 : i32
    %c0_i32_0 = arith.constant 0 : i32
    return %c0_i32 : i32
  }
  func.func @transform_6(%arg0: i32) -> i32 {
    %c0_i32 = arith.constant 0 : i32
    %c0_i32_0 = arith.constant 0 : i32
    return %c0_i32 : i32
  }
  func.func @transform_7(%arg0: i32) -> (i32, i32, i32) {
    %c0_i32 = arith.constant 0 : i32
    %c0_i32_0 = arith.constant 0 : i32
    %c0_i32_1 = arith.constant 0 : i32
    return %arg0, %c0_i32, %c0_i32_0 : i32, i32, i32
  }
}

</mosaic_0001>

<bundles_post_ra>
// kernel: tpu_custom_call.1
= control target key start
LH: loop header
LB: loop body
LE: loop exit
PB: predicated region body
PF: predicated region fallthrough
CT: control target
= control target key end

     0   :  { %s717_s0 = inlined_call_operand.vmem [shape: bf16[2,32,16], index: 0, kind: input, shape index: {}]   ;;  %s718_s1 = inlined_call_operand.vmem [shape: bf16[2,32,16], index: 1, kind: input, shape index: {}]   ;;  %s719_s2 = inlined_call_operand.vmem [shape: f32[32,1], index: 2, kind: input, shape index: {}]   ;;  %s720_s3 = inlined_call_operand.vmem [shape: f32[32,1], index: 3, kind: input, shape index: {}]   ;;  %s721_s4 = inlined_call_operand.vmem [shape: f32[2,16], index: 4, kind: input, shape index: {}]   ;;  %s722_s5 = inlined_call_operand.vmem [shape: f32[2], index: 5, kind: input, shape index: {}]   ;;  %s723_s6 = inlined_call_operand.<no memory space> [shape: f32[1], index: 6, kind: input, shape index: {}]   ;;  %s724_s7 = inlined_call_operand.vmem [shape: f32[2,1,1], index: 7, kind: output, shape index: {}]  }
   0x1   :  { %12 = sst [smem:[#allocation2]] %s723_s6 }
   0x2   :  { %13 = vsyncpa [#allocation4], 0  ;;  %s636_s26 = smov 0  }
   0x3 LB: > { %s642_s27 = sadd.s32 4294967295, %s589_s26   ;;  %p510_p0 = scmp.ge.s32.totalorder %s589_s26, 1  ;;  %s589_s26 = sphi %s636_s26, %s19_s26  }
   0x4   : > { %p207_p1 = scmp.lt.s32.totalorder %s589_s26, 3  ;;  %s229_s6 = sshll.u32 %s722_s5, 4  ;;  %s230_s6 = int_to_ptr.vmem [resolvable:$true] %s229_s6 }
   0x5   : > { %p550_p3 = scmp.eq.s32.totalorder %s642_s27, 0  ;;  %s564_s8 = scalar_lea.vmem %s230_s6, 16 }
   0x6   : > { %p649_p2 = pnand %p510_p0, %p207_p1  ;;  %p565_p6 = scmp.ne.s32.totalorder %s230_s6, %s564_s8 }
   0x7   : > { %p572_p10 = scmp.lt.s32.totalorder %s230_s6, %s230_s6  ;;  %p573_p11 = scmp.lt.s32.totalorder %s564_s8, %s564_s8 }
   0x8   : > { %p546_p4 = pneg %p649_p2 }
   0x9   : > { %p574_p12 = por %p573_p11, %p572_p10 }
   0xa   : > { %p547_p5 = pnand %p550_p3, %p546_p4 }
   0xc   : > { %p566_p7 = pneg %p547_p5 }
   0xe   : > { %p567_p8 = pnand %p566_p7, %p565_p6 }
  0x10   : > { %p568_p9 = pneg %p567_p8 }
  0x12   : > { %p575_p13 = pnand %p574_p12, %p568_p9 }
  0x14   : > { %578 = shalt.err (!%p575_p13)
}
  0x15   : > { %s591_s9 = smov [#allocation3]   ;;  %261 = sbr.rel (%p649_p2) target bundleno = 344 (0x158), region = 48 }
  0x16   : > { %549 = dma.vmem_to_smem (!%p547_p5), %s230_s6, 16, %s591_s9, [#allocation4]  }
  0x1c   : > { %584 = dma.done.wait (%p550_p3), [#allocation4], 16  }
  0x1d   : > { %586 = vsyncadd (%p550_p3), [#allocation4], 4294967280 }
  0x1e   : > { %267 = sfence }
  0x1f   : > { %v381_v0 = vld [vmem:[%s720_s3] sm:$0xff]  ;;  %v592_v2 = vmov 0   ;;  %v382_v3 = vld [vmem:[%s720_s3 + $0x8] sm:$0xff]  ;;  %v383_v5 = vld [vmem:[%s720_s3 + $0x10] sm:$0xff]  ;;  %p297_p0 = scmp.lt.s32.totalorder %s642_s27, 1  ;;  %vm349_vm0 = vcmask 130048  }
  0x20   : > { %v321_v1 = vld [vmem:[%s719_s2] sm:$0xff]  ;;  %563 = vset.pattern.permute.xlu1 %v592_v2  ;;  %562 = vset.pattern.permute.xlu0 %v592_v2  ;;  %v322_v4 = vld [vmem:[%s719_s2 + $0x8] sm:$0xff]  ;;  %v323_v6 = vld [vmem:[%s719_s2 + $0x10] sm:$0xff]  ;;  %s519_s11 = sld [smem:[#allocation3 + $0x1]]  ;;  %s363_s12 = sld [smem:[#allocation3]]  ;;  %vm427_vm1 = vcmask 123905  }
  0x21   : > { %387 = vperm.xlu1 %563, %v381_v0   ;;  %327 = vperm.xlu0 %562, %v321_v1   ;;  %v384_v7 = vld [vmem:[%s720_s3 + $0x18] sm:$0xff]  ;;  %s727_s27 = smov (!%p297_p0, %s642_s27), 1  ;;  %vm368_vm2 = vcmask 122880   ;;  %s311_s15 = sld [smem:[#allocation2]]  ;;  %vm435_vm3 = vcmask 0  }
  0x22   : > { %v324_v8 = vld [vmem:[%s719_s2 + $0x18] sm:$0xff]  ;;  %s522_s28 = sshll.u32 %s727_s27, 4  ;;  %s309_s18 = scalar_lea.vmem %s724_s7, %s727_s27 }
  0x23   : > { %s306_s30 = scalar_lea.vmem %s718_s1, %s522_s28  ;;  %s301_s10 = scalar_lea.vmem %s717_s0, %s522_s28 }
  0x24   : > { %v533_v10 = vld [vmem:[%s306_s30] sm:$0xff]   ;;  %v541_v15 = vld [vmem:[%s306_s30 + $0x8] sm:$0xff]  }
  0x25   : > { %392 = vperm.xlu1 %563, %v382_v3   ;;  %332 = vperm.xlu0 %562, %v322_v4   ;;  %v525_v12 = vld [vmem:[%s301_s10] sm:$0xff]   ;;  %v535_v13 = vunpack.c.h.bf16 %v533_v10  ;;  %v540_v16 = vld [vmem:[%s301_s10 + $0x8] sm:$0xff]   ;;  %v534_v17 = vunpack.c.l.bf16 %v533_v10  ;;  %v538_v23 = vunpack.c.l.bf16 %v541_v15  ;;  %v539_v29 = vunpack.c.h.bf16 %v541_v15 }
  0x26   : > { %v527_v14 = vunpack.c.h.bf16 %v525_v12  ;;  %v526_v18 = vunpack.c.l.bf16 %v525_v12  ;;  %v530_v24 = vunpack.c.l.bf16 %v540_v16  ;;  %v531_v30 = vunpack.c.h.bf16 %v540_v16  ;;  %v310_v3 = vld [vmem:[%s721_s4] sm:$0x3] }
  0x27   : > { %v423_v61 = vstv %s519_s11  ;;  %v364_v62 = vstv %s363_s12  ;;  %v312_v10 = vstv %s311_s15 }
  0x29   : > { %397 = vperm.xlu1 %563, %v383_v5   ;;  %337 = vperm.xlu0 %562, %v323_v6  }
  0x2d   : > { %402 = vperm.xlu1 %563, %v384_v7   ;;  %342 = vperm.xlu0 %562, %v324_v8  }
  0xa0   : > { %v388_v9 = vpop.permute.xlu1 %387  ;;  %v328_v11 = vpop.permute.xlu0 %327 }
  0xa1   : > { %v405_v25 = vmul.f32 %v534_v17, %v388_v9  ;;  %v345_v26 = vmul.f32 %v526_v18, %v328_v11 }
  0xa3   : > { %v409_v35 = vsel %vm349_vm0, %v405_v25, 0.0  ;;  %v350_v36 = vsel %vm349_vm0, %v345_v26, 0.0 }
  0xa4   : > { %v393_v19 = vpop.permute.xlu1 %392  ;;  %v333_v20 = vpop.permute.xlu0 %332 }
  0xa5   : > { %v406_v21 = vmul.f32 %v535_v13, %v393_v19  ;;  %v346_v22 = vmul.f32 %v527_v14, %v333_v20 }
  0xa7   : > { %v410_v31 = vsel %vm349_vm0, %v406_v21, 0.0  ;;  %v351_v32 = vsel %vm349_vm0, %v346_v22, 0.0 }
  0xa8   : > { %v398_v27 = vpop.permute.xlu1 %397  ;;  %v338_v28 = vpop.permute.xlu0 %337  ;;  %v411_v39 = vadd.f32 %v410_v31, %v409_v35  ;;  %v352_v40 = vadd.f32 %v351_v32, %v350_v36 }
  0xa9   : > { %v407_v33 = vmul.f32 %v538_v23, %v398_v27  ;;  %v347_v34 = vmul.f32 %v530_v24, %v338_v28 }
  0xab   : > { %v412_v37 = vsel %vm349_vm0, %v407_v33, 0.0  ;;  %v353_v38 = vsel %vm349_vm0, %v347_v34, 0.0 }
  0xac   : > { %v403_v41 = vpop.permute.xlu1 %402  ;;  %v343_v42 = vpop.permute.xlu0 %342  ;;  %v413_v45 = vadd.f32 %v412_v37, %v411_v39  ;;  %v354_v46 = vadd.f32 %v353_v38, %v352_v40 }
  0xad   : > { %v408_v43 = vmul.f32 %v539_v29, %v403_v41  ;;  %v348_v44 = vmul.f32 %v531_v30, %v343_v42 }
  0xaf   : > { %v414_v47 = vsel %vm349_vm0, %v408_v43, 0.0  ;;  %v355_v48 = vsel %vm349_vm0, %v348_v44, 0.0 }
  0xb0   : > { %v415_v49 = vadd.f32 %v414_v47, %v413_v45  ;;  %v356_v50 = vadd.f32 %v355_v48, %v354_v46 }
  0xb2   : > { %v416_v51 = vrot.slane %v415_v49, 4  ;;  %v357_v52 = vrot.slane %v356_v50, 4 }
  0xb4   : > { %v417_v53 = vadd.f32 %v416_v51, %v415_v49  ;;  %v358_v54 = vadd.f32 %v357_v52, %v356_v50 }
  0xb6   : > { %v418_v55 = vrot.slane %v417_v53, 2  ;;  %v359_v56 = vrot.slane %v358_v54, 2 }
  0xb8   : > { %v419_v57 = vadd.f32 %v418_v55, %v417_v53  ;;  %v360_v58 = vadd.f32 %v359_v56, %v358_v54 }
  0xba   : > { %v420_v59 = vrot.slane %v419_v57, 1  ;;  %v361_v60 = vrot.slane %v360_v58, 1 }
  0xbc   : > { %v421_v63 = vadd.f32 %v420_v59, %v419_v57  ;;  %v362_v0 = vadd.f32 %v361_v60, %v360_v58 }
  0xbe   : > { %v424_v1 = vadd.f32 %v423_v61, %v421_v63  ;;  %v365_v2 = vadd.f32 %v364_v62, %v362_v0 }
  0xc0   : > { %v425_v4 = vmax.f32 %v424_v1, 0.0  ;;  %v366_v5 = vmax.f32 %v365_v2, 0.0 }
  0xc2   : > { %v426_v6 = vmul.f32 %v425_v4, %v310_v3  ;;  %v367_v7 = vmul.f32 %v366_v5, %v310_v3 }
  0xc4   : > { %v428_v8 = vsel %vm427_vm1, %v426_v6, 0.0  ;;  %v369_v9 = vsel %vm368_vm2, %v367_v7, 0.0 }
  0xc5   : > { %429 = vadd.xlane.f32.xlu1 %v428_v8  ;;  %370 = vadd.xlane.f32.xlu0 %v369_v9 }
 0x152   : > { %v430_v11 = vpop.xlane.xlu1 %429  ;;  %v371_v12 = vpop.xlane.xlu0 %370 }
 0x153   : > { %v432_v13 = vrot.slane %v430_v11, 1  ;;  %v372_v14 = vadd.f32 %v371_v12, %v312_v10 }
 0x155   : > { %v434_v15 = vadd.f32 %v432_v13, %v372_v14 }
 0x157   : > { %436 = vst.msk [vmem:[%s309_s18] sm:$0x1] %vm435_vm3, %v434_v15 }
 0x158 PF: > { %s19_s26 = sadd.s32 1, %s589_s26  }
 0x159   : > { %p16_p1 = scmp.ge.s32.totalorder %s19_s26, 4  }
 0x15b   :  { %18 = sbr.rel (!%p16_p1) target bundleno = 3 (0x3), region = 86 }
 0x162   :  { %454 = vsyncpa [#allocation4], 1 }
 0x163   :  { %456 = vsyncpa [#allocation4 + $0x1], 1 }

</bundles_post_ra>
